<compile_context>
chip_gen: v6e
topology: v6e:2x2x1
jax: 0.10.0
libtpu: 0.0.40
codegen_flags: <defaults>
</compile_context>

<pallas_src>
import functools

import jax
import jax.numpy as jnp
from jax.experimental import pallas as pl
from jax.experimental.pallas import tpu as pltpu

HIDDEN_PAD = 128        # hidden 64 padded to full 128-lane vreg width (matmul only)
OUT_PAD = 128           # padded w3/b3 cols for the in-kernel matmul; NOT written to HBM
MAX_TILE_B = 1024       # max batch rows per grid step
SINGLE_STEP_MAX_B = 64  # below this, one full-batch block (splitting is pure overhead)


def _round_up(n, m):
    return ((n + m - 1) // m) * m


def _choose_tile_b(B, max_tile_b=MAX_TILE_B):
    """Pick the batch tile. Small B -> one full-dim block (always a legal block shape,
    zero padding). Larger B -> >=2 roughly equal tiles, each a multiple of 8 rows,
    capped at max_tile_b; the last block may be partial (Pallas masks it)."""
    if B <= SINGLE_STEP_MAX_B:
        return B
    steps = max(2, pl.cdiv(B, max_tile_b))          # >=2 steps: feeds both v7x TCs
    return min(max_tile_b, _round_up(pl.cdiv(B, steps), 8))


def dqn_kernel(x_ref, w1_ref, b1_ref, w2_ref, b2_ref, w3_ref, b3_ref, o_ref, *, out_size):
    # One batch tile; weights/biases are resident VMEM blocks shared by all grid steps.
    x = x_ref[...]
    h1 = jnp.dot(x, w1_ref[...], preferred_element_type=jnp.float32) + b1_ref[...]
    h1 = jnp.maximum(h1, 0.0)                        # relu(fc1)
    h2 = jnp.dot(h1, w2_ref[...], preferred_element_type=jnp.float32) + b2_ref[...]
    h2 = jnp.maximum(h2, 0.0)                        # relu(fc2)
    out = jnp.dot(h2, w3_ref[...], preferred_element_type=jnp.float32) + b3_ref[...]
    # Store only the real output columns: tiny masked vst, 32x less HBM writeback
    # than writing the 128-wide padded result.
    o_ref[...] = out[:, :out_size].astype(o_ref.dtype)


def pad_params(params):
    """Zero-pad hidden (64->HIDDEN_PAD) and the fc3 output cols (->OUT_PAD). Padding
    is exact: zero rows/cols contribute 0 and ReLU keeps padded columns at 0."""
    w1, b1 = params["w1"], params["b1"]
    w2, b2 = params["w2"], params["b2"]
    w3, b3 = params["w3"], params["b3"]
    h_pad = HIDDEN_PAD - w1.shape[1]
    o_pad = OUT_PAD - w3.shape[1]
    return {
        "w1": jnp.pad(w1, ((0, 0), (0, h_pad))),
        "b1": jnp.pad(b1, ((0, 0), (0, h_pad))),
        "w2": jnp.pad(w2, ((0, h_pad), (0, h_pad))),
        "b2": jnp.pad(b2, ((0, 0), (0, h_pad))),
        "w3": jnp.pad(w3, ((0, h_pad), (0, o_pad))),
        "b3": jnp.pad(b3, ((0, 0), (0, o_pad))),
    }


def dqn_forward(x, padded_params, out_size, max_tile_b=MAX_TILE_B):
    """x: (B, input_size) f32. padded_params: output of pad_params(). Returns (B, out_size)."""
    B, in_size = x.shape
    H = padded_params["w1"].shape[1]     # HIDDEN_PAD
    OP = padded_params["w3"].shape[1]    # OUT_PAD (VMEM-only; never DMA'd to the output)

    tile_b = _choose_tile_b(B, max_tile_b)
    grid = (pl.cdiv(B, tile_b),)         # partial last block is masked by Pallas

    out = pl.pallas_call(
        functools.partial(dqn_kernel, out_size=out_size),
        out_shape=jax.ShapeDtypeStruct((B, out_size), jnp.float32),
        grid=grid,
        in_specs=[
            pl.BlockSpec((tile_b, in_size), lambda i: (i, 0)),   # x: tiled over batch
            pl.BlockSpec((in_size, H), lambda i: (0, 0)),        # w1: resident
            pl.BlockSpec((1, H), lambda i: (0, 0)),              # b1
            pl.BlockSpec((H, H), lambda i: (0, 0)),              # w2
            pl.BlockSpec((1, H), lambda i: (0, 0)),              # b2
            pl.BlockSpec((H, OP), lambda i: (0, 0)),             # w3
            pl.BlockSpec((1, OP), lambda i: (0, 0)),             # b3
        ],
        out_specs=pl.BlockSpec((tile_b, out_size), lambda i: (i, 0)),  # real-width output
        compiler_params=pltpu.CompilerParams(
            dimension_semantics=("parallel",),                   # v7x: shard batch across TCs
        ),
    )(x, padded_params["w1"], padded_params["b1"],
      padded_params["w2"], padded_params["b2"],
      padded_params["w3"], padded_params["b3"])

    return out


dqn_forward_jit = jax.jit(dqn_forward, static_argnames=("out_size", "max_tile_b"))


def init_params(key, input_size, hidden, output_size):
    """PyTorch nn.Linear default init: U[-1/sqrt(fan_in), 1/sqrt(fan_in)]."""
    ks = jax.random.split(key, 6)

    def lin(kw, kb, fan_in, fan_out):
        bound = 1.0 / jnp.sqrt(jnp.float32(fan_in))
        w = jax.random.uniform(kw, (fan_in, fan_out), jnp.float32, -bound, bound)
        b = jax.random.uniform(kb, (1, fan_out), jnp.float32, -bound, bound)
        return w, b

    w1, b1 = lin(ks[0], ks[1], input_size, hidden)
    w2, b2 = lin(ks[2], ks[3], hidden, hidden)
    w3, b3 = lin(ks[4], ks[5], hidden, output_size)
    return {"w1": w1, "b1": b1, "w2": w2, "b2": b2, "w3": w3, "b3": b3}


def dqn_forward_ref(x, p):
    h1 = jnp.maximum(x @ p["w1"] + p["b1"], 0.0)
    h2 = jnp.maximum(h1 @ p["w2"] + p["b2"], 0.0)
    return h2 @ p["w3"] + p["b3"]


if __name__ == "__main__":
    # Small shapes consistent with the module: env observation -> 64 -> 64 -> n_actions.
    input_size = 16   # stand-in for env.observation_space.shape[0]
    hidden = 64
    output_size = 4   # stand-in for env.action_space.n

    key = jax.random.PRNGKey(0)
    kx, kp, kx2, kx3 = jax.random.split(key, 4)
    params = init_params(kp, input_size, hidden, output_size)
    pparams = pad_params(params)

    # Small batch: single full-batch block, no padding anywhere.
    x = jax.random.normal(kx, (8, input_size), jnp.float32)
    out = jax.block_until_ready(dqn_forward_jit(x, pparams, out_size=output_size))
    ref = dqn_forward_ref(x, params)
    assert out.shape == (8, output_size)
    assert jnp.allclose(out, ref, atol=1e-4, rtol=1e-4), "mismatch vs JAX reference (small batch)"

    # Larger batch: splits into two 192-row tiles (exactly, no padding), exercising the grid.
    x2 = jax.random.normal(kx2, (384, input_size), jnp.float32)
    out2 = jax.block_until_ready(dqn_forward_jit(x2, pparams, out_size=output_size))
    ref2 = dqn_forward_ref(x2, params)
    assert out2.shape == (384, output_size)
    assert jnp.allclose(out2, ref2, atol=1e-4, rtol=1e-4), "mismatch vs JAX reference (gridded batch)"

    # Ragged batch: exercises the partial final block (masked OOB reads/writes).
    x3 = jax.random.normal(kx3, (100, input_size), jnp.float32)
    out3 = jax.block_until_ready(dqn_forward_jit(x3, pparams, out_size=output_size))
    ref3 = dqn_forward_ref(x3, params)
    assert out3.shape == (100, output_size)
    assert jnp.allclose(out3, ref3, atol=1e-4, rtol=1e-4), "mismatch vs JAX reference (ragged batch)"

    print("KERNEL_OK")
</pallas_src>

<mosaic_0001>
module attributes {stable_mosaic.version = 11 : i64} {
  func.func @dqn_kernel(%arg0: i32, %arg1: memref<8x16xf32, #tpu.memory_space<vmem>>, %arg2: memref<16x128xf32, #tpu.memory_space<vmem>>, %arg3: memref<1x128xf32, #tpu.memory_space<vmem>>, %arg4: memref<128x128xf32, #tpu.memory_space<vmem>>, %arg5: memref<1x128xf32, #tpu.memory_space<vmem>>, %arg6: memref<128x128xf32, #tpu.memory_space<vmem>>, %arg7: memref<1x128xf32, #tpu.memory_space<vmem>>, %arg8: memref<8x4xf32, #tpu.memory_space<vmem>>) attributes {dimension_semantics = [#tpu.dimension_semantics<parallel>], iteration_bounds = array<i64: 1>, scalar_prefetch = 0 : i64, scratch_operands = 0 : i64, tpu.core_type = #tpu.core_type<tc>, window_params = [{transform_indices = @transform_0, window_bounds = array<i64: 8, 16>}, {pipeline_mode = #tpu.pipeline_mode<synchronous>, transform_indices = @transform_1, window_bounds = array<i64: 16, 128>}, {pipeline_mode = #tpu.pipeline_mode<synchronous>, transform_indices = @transform_2, window_bounds = array<i64: 1, 128>}, {pipeline_mode = #tpu.pipeline_mode<synchronous>, transform_indices = @transform_3, window_bounds = array<i64: 128, 128>}, {pipeline_mode = #tpu.pipeline_mode<synchronous>, transform_indices = @transform_4, window_bounds = array<i64: 1, 128>}, {pipeline_mode = #tpu.pipeline_mode<synchronous>, transform_indices = @transform_5, window_bounds = array<i64: 128, 128>}, {pipeline_mode = #tpu.pipeline_mode<synchronous>, transform_indices = @transform_6, window_bounds = array<i64: 1, 128>}, {transform_indices = @transform_7, window_bounds = array<i64: 8, 4>}]} {
    %c0 = arith.constant 0 : index
    %c0_0 = arith.constant 0 : index
    %0 = vector.load %arg1[%c0, %c0_0] : memref<8x16xf32, #tpu.memory_space<vmem>>, vector<8x16xf32>
    %c0_1 = arith.constant 0 : index
    %c0_2 = arith.constant 0 : index
    %1 = vector.load %arg2[%c0_1, %c0_2] : memref<16x128xf32, #tpu.memory_space<vmem>>, vector<16x128xf32>
    %cst = arith.constant dense<0.000000e+00> : vector<8x128xf32>
    %2 = tpu.matmul %0, %1, %cst {dimension_numbers = #tpu.dot_dimension_numbers<[1], [0], [0], [1], [0, 0, 1, 1], [], []>} : vector<8x16xf32>, vector<16x128xf32>, vector<8x128xf32> -> vector<8x128xf32>
    %c0_3 = arith.constant 0 : index
    %c0_4 = arith.constant 0 : index
    %3 = vector.load %arg3[%c0_3, %c0_4] : memref<1x128xf32, #tpu.memory_space<vmem>>, vector<1x128xf32>
    %4 = vector.broadcast %3 : vector<1x128xf32> to vector<8x128xf32>
    %5 = arith.addf %2, %4 : vector<8x128xf32>
    %cst_5 = arith.constant 0.000000e+00 : f32
    %6 = vector.broadcast %cst_5 : f32 to vector<8x128xf32>
    %7 = arith.maximumf %5, %6 : vector<8x128xf32>
    %c0_6 = arith.constant 0 : index
    %c0_7 = arith.constant 0 : index
    %8 = vector.load %arg4[%c0_6, %c0_7] : memref<128x128xf32, #tpu.memory_space<vmem>>, vector<128x128xf32>
    %cst_8 = arith.constant dense<0.000000e+00> : vector<8x128xf32>
    %9 = tpu.matmul %7, %8, %cst_8 {dimension_numbers = #tpu.dot_dimension_numbers<[1], [0], [0], [1], [0, 0, 1, 1], [], []>} : vector<8x128xf32>, vector<128x128xf32>, vector<8x128xf32> -> vector<8x128xf32>
    %c0_9 = arith.constant 0 : index
    %c0_10 = arith.constant 0 : index
    %10 = vector.load %arg5[%c0_9, %c0_10] : memref<1x128xf32, #tpu.memory_space<vmem>>, vector<1x128xf32>
    %11 = vector.broadcast %10 : vector<1x128xf32> to vector<8x128xf32>
    %12 = arith.addf %9, %11 : vector<8x128xf32>
    %cst_11 = arith.constant 0.000000e+00 : f32
    %13 = vector.broadcast %cst_11 : f32 to vector<8x128xf32>
    %14 = arith.maximumf %12, %13 : vector<8x128xf32>
    %c0_12 = arith.constant 0 : index
    %c0_13 = arith.constant 0 : index
    %15 = vector.load %arg6[%c0_12, %c0_13] : memref<128x128xf32, #tpu.memory_space<vmem>>, vector<128x128xf32>
    %cst_14 = arith.constant dense<0.000000e+00> : vector<8x128xf32>
    %16 = tpu.matmul %14, %15, %cst_14 {dimension_numbers = #tpu.dot_dimension_numbers<[1], [0], [0], [1], [0, 0, 1, 1], [], []>} : vector<8x128xf32>, vector<128x128xf32>, vector<8x128xf32> -> vector<8x128xf32>
    %c0_15 = arith.constant 0 : index
    %c0_16 = arith.constant 0 : index
    %17 = vector.load %arg7[%c0_15, %c0_16] : memref<1x128xf32, #tpu.memory_space<vmem>>, vector<1x128xf32>
    %18 = vector.broadcast %17 : vector<1x128xf32> to vector<8x128xf32>
    %19 = arith.addf %16, %18 : vector<8x128xf32>
    %20 = vector.extract_strided_slice %19 {offsets = [0, 0], sizes = [8, 4], strides = [1, 1]} : vector<8x128xf32> to vector<8x4xf32>
    %c0_17 = arith.constant 0 : index
    %c0_18 = arith.constant 0 : index
    %21 = vector.load %arg8[%c0_17, %c0_18] : memref<8x4xf32, #tpu.memory_space<vmem>>, vector<8x4xf32>
    tpu.vector_store %arg8[%c0_17, %c0_18], %20 {strides = array<i32>} : memref<8x4xf32, #tpu.memory_space<vmem>>, vector<8x4xf32>,
    return
  }
  func.func @transform_0(%arg0: i32) -> (i32, i32) {
    %c0_i32 = arith.constant 0 : i32
    %c0_i32_0 = arith.constant 0 : i32
    return %arg0, %c0_i32 : i32, i32
  }
  func.func @transform_1(%arg0: i32) -> (i32, i32) {
    %c0_i32 = arith.constant 0 : i32
    %c0_i32_0 = arith.constant 0 : i32
    %c0_i32_1 = arith.constant 0 : i32
    return %c0_i32, %c0_i32_0 : i32, i32
  }
  func.func @transform_2(%arg0: i32) -> (i32, i32) {
    %c0_i32 = arith.constant 0 : i32
    %c0_i32_0 = arith.constant 0 : i32
    %c0_i32_1 = arith.constant 0 : i32
    return %c0_i32, %c0_i32_0 : i32, i32
  }
  func.func @transform_3(%arg0: i32) -> (i32, i32) {
    %c0_i32 = arith.constant 0 : i32
    %c0_i32_0 = arith.constant 0 : i32
    %c0_i32_1 = arith.constant 0 : i32
    return %c0_i32, %c0_i32_0 : i32, i32
  }
  func.func @transform_4(%arg0: i32) -> (i32, i32) {
    %c0_i32 = arith.constant 0 : i32
    %c0_i32_0 = arith.constant 0 : i32
    %c0_i32_1 = arith.constant 0 : i32
    return %c0_i32, %c0_i32_0 : i32, i32
  }
  func.func @transform_5(%arg0: i32) -> (i32, i32) {
    %c0_i32 = arith.constant 0 : i32
    %c0_i32_0 = arith.constant 0 : i32
    %c0_i32_1 = arith.constant 0 : i32
    return %c0_i32, %c0_i32_0 : i32, i32
  }
  func.func @transform_6(%arg0: i32) -> (i32, i32) {
    %c0_i32 = arith.constant 0 : i32
    %c0_i32_0 = arith.constant 0 : i32
    %c0_i32_1 = arith.constant 0 : i32
    return %c0_i32, %c0_i32_0 : i32, i32
  }
  func.func @transform_7(%arg0: i32) -> (i32, i32) {
    %c0_i32 = arith.constant 0 : i32
    %c0_i32_0 = arith.constant 0 : i32
    return %arg0, %c0_i32 : i32, i32
  }
}

</mosaic_0001>

<bundles_post_ra>
// kernel: dqn_forward.1
= control target key start
LH: loop header
LB: loop body
LE: loop exit
PB: predicated region body
PF: predicated region fallthrough
CT: control target
= control target key end

     0   :  { %12 = vsyncpa [#allocation3], 0  ;;  %s693_s0 = inlined_call_operand.hbm [shape: f32[8,16], index: 0, kind: input, shape index: {}]   ;;  %s694_s1 = inlined_call_operand.hbm [shape: f32[16,128], index: 1, kind: input, shape index: {}]   ;;  %s695_s2 = inlined_call_operand.vmem [shape: f32[1,128], index: 2, kind: input, shape index: {}]   ;;  %s696_s3 = inlined_call_operand.hbm [shape: f32[128,128], index: 3, kind: input, shape index: {}]   ;;  %s697_s4 = inlined_call_operand.vmem [shape: f32[1,128], index: 4, kind: input, shape index: {}]   ;;  %s698_s5 = inlined_call_operand.hbm [shape: f32[128,128], index: 5, kind: input, shape index: {}]   ;;  %s699_s6 = inlined_call_operand.vmem [shape: f32[1,128], index: 6, kind: input, shape index: {}]   ;;  %s700_s7 = inlined_call_operand.vmem [shape: f32[8,4], index: 7, kind: output, shape index: {}]  }
   0x1   :  { %13 = vsyncpa [#allocation5], 0 }
   0x2   :  { %14 = vsyncpa [#allocation8], 0  ;;  %s572_s24 = smov [#allocation4]  }
   0x3   :  { %s30_s25 = sshll.u32 %s572_s24, 4  ;;  %s31_s25 = int_to_ptr.vmem [resolvable:$true] %s30_s25 }
   0x4   :  { %s494_s26 = scalar_lea.vmem %s31_s25, 256  ;;  %p499_p1 = scmp.lt.s32.totalorder %s31_s25, %s31_s25 }
   0x5   :  { %p495_p0 = scmp.ne.s32.totalorder %s31_s25, %s494_s26  ;;  %p500_p2 = scmp.lt.s32.totalorder %s494_s26, %s494_s26 }
   0x7   :  { %p501_p3 = por %p500_p2, %p499_p1 }
   0x9   :  { %p502_p4 = pnand %p501_p3, %p495_p0 }
   0xb   :  { %505 = shalt.err (!%p502_p4)
}
   0xc   :  { %s573_s27 = smov 128   ;;  %s574_s28 = smov 8  }
   0xd   :  { %36 = dma.hbm_to_vmem [thread:$0]  %s694_s1, 256, %s31_s25, [#allocation5], %s573_s27, %s573_s27, %s574_s28  }
   0xe   :  { %s575_s8 = smov [#allocation2]   ;;  %s576_s10 = smov [#allocation6]  }
   0xf   :  { %s21_s9 = sshll.u32 %s575_s8, 4  ;;  %s44_s11 = sshll.u32 %s576_s10, 4  ;;  %s22_s9 = int_to_ptr.vmem [resolvable:$true] %s21_s9  ;;  %s45_s11 = int_to_ptr.vmem [resolvable:$true] %s44_s11 }
  0x10   :  { %s514_s12 = scalar_lea.vmem %s22_s9, 128  ;;  %p519_p6 = scmp.lt.s32.totalorder %s22_s9, %s22_s9 }
  0x11   :  { %p515_p5 = scmp.ne.s32.totalorder %s22_s9, %s514_s12  ;;  %p520_p7 = scmp.lt.s32.totalorder %s514_s12, %s514_s12 }
  0x13   :  { %p521_p8 = por %p520_p7, %p519_p6 }
  0x15   :  { %p522_p9 = pnand %p521_p8, %p515_p5 }
  0x17   :  { %525 = shalt.err (!%p522_p9)
}
  0x18   :  { %24 = dma.hbm_to_vmem [thread:$0]  %s693_s0, 128, %s22_s9, [#allocation3]  }
  0x19   :  { %s534_s15 = scalar_lea.vmem %s45_s11, 2048  ;;  %p539_p11 = scmp.lt.s32.totalorder %s45_s11, %s45_s11 }
  0x1a   :  { %p535_p10 = scmp.ne.s32.totalorder %s45_s11, %s534_s15  ;;  %p540_p12 = scmp.lt.s32.totalorder %s534_s15, %s534_s15 }
  0x1c   :  { %p541_p13 = por %p540_p12, %p539_p11 }
  0x1e   :  { %p542_p0 = pnand %p541_p13, %p535_p10 }
  0x20   :  { %545 = shalt.err (!%p542_p0)
}
  0x21   :  { %50 = dma.hbm_to_vmem [thread:$0]  %s696_s3, 2048, %s45_s11, [#allocation5], %s573_s27, %s573_s27, %s574_s28  }
  0x22   :  { %s577_s17 = smov [#allocation7]  }
  0x23   :  { %s58_s18 = sshll.u32 %s577_s17, 4  ;;  %s59_s18 = int_to_ptr.vmem [resolvable:$true] %s58_s18 }
  0x24   :  { %s554_s19 = scalar_lea.vmem %s59_s18, 2048  ;;  %p559_p2 = scmp.lt.s32.totalorder %s59_s18, %s59_s18 }
  0x25   :  { %p555_p1 = scmp.ne.s32.totalorder %s59_s18, %s554_s19  ;;  %p560_p3 = scmp.lt.s32.totalorder %s554_s19, %s554_s19 }
  0x27   :  { %p561_p4 = por %p560_p3, %p559_p2 }
  0x29   :  { %p562_p5 = pnand %p561_p4, %p555_p1 }
  0x2b   :  { %565 = shalt.err (!%p562_p5)
}
  0x2c   :  { %64 = dma.hbm_to_vmem [thread:$0]  %s698_s5, 2048, %s59_s18, [#allocation8], %s573_s27, %s573_s27, %s574_s28  }
  0x2d   :  { %566 = dma.done.wait [#allocation3], 128  }
  0x2e   :  { %567 = vsyncadd [#allocation3], 4294967168 }
  0x2f   :  { %568 = dma.done.wait [#allocation5], 2304  }
  0x30   :  { %569 = vsyncadd [#allocation5], 4294964992 }
  0x31   :  { %570 = dma.done.wait [#allocation8], 2048  }
  0x32   :  { %571 = vsyncadd [#allocation8], 4294965248  ;;  %v578_v0 = vmov 0.0   ;;  %vm579_vm0 = vmmov 0   ;;  %v81_v1 = vld [vmem:[#allocation4 + $0x8] sm:$0xff]  ;;  %v80_v2 = vld [vmem:[#allocation4] sm:$0xff] }
  0x33   :  { %401 = vmatprep.subr.mxu0 %v578_v0  ;;  %405 = vmatprep.mubr.msk.f32.mxu0 %vm579_vm0, %v578_v0  ;;  %v79_v3 = vld [vmem:[#allocation2] sm:$0xff]  ;;  %vm89_vm1 = vcmask 130048   ;;  %v179_v4 = vld [vmem:[#allocation6 + $0x78] sm:$0xff]  ;;  %v178_v5 = vld [vmem:[#allocation6 + $0x70] sm:$0xff]  ;;  %vm351_vm2 = vcmask 31744  }
  0x34   :  { %408 = vmatprep.subr.mxu1 %v578_v0  ;;  %440 = vmatprep.mubr.msk.f32.mxu1 %vm579_vm0, %v578_v0  ;;  %v177_v6 = vld [vmem:[#allocation6 + $0x68] sm:$0xff]  ;;  %v176_v7 = vld [vmem:[#allocation6 + $0x60] sm:$0xff]  ;;  %v175_v8 = vld [vmem:[#allocation6 + $0x58] sm:$0xff] }
  0x35   :  { %402 = vmatpush3.msra.mxu0 %v81_v1  ;;  %409 = vmatpush3.msra.mxu1 %v179_v4  ;;  %v174_v9 = vld [vmem:[#allocation6 + $0x50] sm:$0xff]  ;;  %v173_v10 = vld [vmem:[#allocation6 + $0x48] sm:$0xff]  ;;  %v172_v11 = vld [vmem:[#allocation6 + $0x40] sm:$0xff] }
  0x36   :  { %403 = vmatprep.subr.mxu0 %v578_v0  ;;  %410 = vmatprep.subr.mxu1 %v578_v0  ;;  %v171_v12 = vld [vmem:[#allocation6 + $0x38] sm:$0xff]  ;;  %v170_v13 = vld [vmem:[#allocation6 + $0x30] sm:$0xff]  ;;  %v169_v14 = vld [vmem:[#allocation6 + $0x28] sm:$0xff] }
  0x37   :  { %404 = vmatpush3.msra.mxu0 %v80_v2  ;;  %411 = vmatpush3.msra.mxu1 %v178_v5  ;;  %v168_v15 = vld [vmem:[#allocation6 + $0x20] sm:$0xff]  ;;  %v167_v16 = vld [vmem:[#allocation6 + $0x18] sm:$0xff]  ;;  %v166_v17 = vld [vmem:[#allocation6 + $0x10] sm:$0xff] }
  0x38   :  { %406 = vmatmul.mubr.msk.f32.vlgmr.msra.gmra.mxu0 %vm89_vm1, %v79_v3  ;;  %412 = vmatprep.subr.mxu1 %v578_v0  ;;  %v165_v18 = vld [vmem:[#allocation6 + $0x8] sm:$0xff]  ;;  %v164_v19 = vld [vmem:[#allocation6] sm:$0xff]  ;;  %v273_v20 = vld [vmem:[#allocation7 + $0x78] sm:$0xff] }
  0x39   :  { %443 = vmatprep.subr.mxu0 %v578_v0  ;;  %413 = vmatpush3.msra.mxu1 %v177_v6  ;;  %v272_v21 = vld [vmem:[#allocation7 + $0x70] sm:$0xff]  ;;  %v271_v22 = vld [vmem:[#allocation7 + $0x68] sm:$0xff]  ;;  %v270_v23 = vld [vmem:[#allocation7 + $0x60] sm:$0xff] }
  0x3a   :  { %475 = vmatprep.mubr.msk.f32.mxu0 %vm579_vm0, %v578_v0  ;;  %414 = vmatprep.subr.mxu1 %v578_v0  ;;  %v269_v24 = vld [vmem:[#allocation7 + $0x58] sm:$0xff]  ;;  %v268_v25 = vld [vmem:[#allocation7 + $0x50] sm:$0xff]  ;;  %v267_v26 = vld [vmem:[#allocation7 + $0x48] sm:$0xff] }
  0x3b   :  { %415 = vmatpush3.msra.mxu1 %v176_v7  ;;  %444 = vmatpush3.msra.mxu0 %v273_v20  ;;  %v266_v27 = vld [vmem:[#allocation7 + $0x40] sm:$0xff]  ;;  %v265_v28 = vld [vmem:[#allocation7 + $0x38] sm:$0xff]  ;;  %v264_v29 = vld [vmem:[#allocation7 + $0x30] sm:$0xff] }
  0x3c   :  { %416 = vmatprep.subr.mxu1 %v578_v0  ;;  %445 = vmatprep.subr.mxu0 %v578_v0  ;;  %v263_v30 = vld [vmem:[#allocation7 + $0x28] sm:$0xff]  ;;  %v262_v31 = vld [vmem:[#allocation7 + $0x20] sm:$0xff]  ;;  %v261_v32 = vld [vmem:[#allocation7 + $0x18] sm:$0xff] }
  0x3d   :  { %417 = vmatpush3.msra.mxu1 %v175_v8  ;;  %446 = vmatpush3.msra.mxu0 %v272_v21  ;;  %v360_v33 = vld [vmem:[%s695_s2] ss:$0 sm:$0xff]  ;;  %v260_v38 = vld [vmem:[#allocation7 + $0x10] sm:$0xff]  ;;  %v258_v40 = vld [vmem:[#allocation7] sm:$0xff] }
  0x3e   :  { %418 = vmatprep.subr.mxu1 %v578_v0  ;;  %447 = vmatprep.subr.mxu0 %v578_v0  ;;  %v259_v39 = vld [vmem:[#allocation7 + $0x8] sm:$0xff] }
  0x3f   :  { %419 = vmatpush3.msra.mxu1 %v174_v9  ;;  %448 = vmatpush3.msra.mxu0 %v271_v22  ;;  %v362_v41 = vld [vmem:[%s697_s4] ss:$0 sm:$0xff] }
  0x40   :  { %420 = vmatprep.subr.mxu1 %v578_v0  ;;  %449 = vmatprep.subr.mxu0 %v578_v0  ;;  %v363_v46 = vld [vmem:[%s699_s6] ss:$0 sm:$0xff] }
  0x41   :  { %421 = vmatpush3.msra.mxu1 %v173_v10  ;;  %450 = vmatpush3.msra.mxu0 %v270_v23 }
  0x42   :  { %422 = vmatprep.subr.mxu1 %v578_v0  ;;  %451 = vmatprep.subr.mxu0 %v578_v0 }
  0x43   :  { %423 = vmatpush3.msra.mxu1 %v172_v11  ;;  %452 = vmatpush3.msra.mxu0 %v269_v24 }
  0x44   :  { %424 = vmatprep.subr.mxu1 %v578_v0  ;;  %453 = vmatprep.subr.mxu0 %v578_v0 }
  0x45   :  { %425 = vmatpush3.msra.mxu1 %v171_v12  ;;  %454 = vmatpush3.msra.mxu0 %v268_v25 }
  0x46   :  { %426 = vmatprep.subr.mxu1 %v578_v0  ;;  %455 = vmatprep.subr.mxu0 %v578_v0 }
  0x47   :  { %427 = vmatpush3.msra.mxu1 %v170_v13  ;;  %456 = vmatpush3.msra.mxu0 %v267_v26 }
  0x48   :  { %428 = vmatprep.subr.mxu1 %v578_v0  ;;  %457 = vmatprep.subr.mxu0 %v578_v0 }
  0x49   :  { %429 = vmatpush3.msra.mxu1 %v169_v14  ;;  %458 = vmatpush3.msra.mxu0 %v266_v27 }
  0x4a   :  { %430 = vmatprep.subr.mxu1 %v578_v0  ;;  %459 = vmatprep.subr.mxu0 %v578_v0 }
  0x4b   :  { %431 = vmatpush3.msra.mxu1 %v168_v15  ;;  %460 = vmatpush3.msra.mxu0 %v265_v28 }
  0x4c   :  { %432 = vmatprep.subr.mxu1 %v578_v0  ;;  %461 = vmatprep.subr.mxu0 %v578_v0 }
  0x4d   :  { %433 = vmatpush3.msra.mxu1 %v167_v16  ;;  %462 = vmatpush3.msra.mxu0 %v264_v29 }
  0x4e   :  { %434 = vmatprep.subr.mxu1 %v578_v0  ;;  %463 = vmatprep.subr.mxu0 %v578_v0 }
  0x4f   :  { %435 = vmatpush3.msra.mxu1 %v166_v17  ;;  %464 = vmatpush3.msra.mxu0 %v263_v30 }
  0x50   :  { %436 = vmatprep.subr.mxu1 %v578_v0  ;;  %465 = vmatprep.subr.mxu0 %v578_v0 }
  0x51   :  { %437 = vmatpush3.msra.mxu1 %v165_v18  ;;  %466 = vmatpush3.msra.mxu0 %v262_v31 }
  0x52   :  { %438 = vmatprep.subr.mxu1 %v578_v0  ;;  %467 = vmatprep.subr.mxu0 %v578_v0 }
  0x53   :  { %439 = vmatpush3.msra.mxu1 %v164_v19  ;;  %468 = vmatpush3.msra.mxu0 %v261_v32 }
  0x54   :  { %469 = vmatprep.subr.mxu0 %v578_v0 }
  0x55   :  { %470 = vmatpush3.msra.mxu0 %v260_v38 }
  0x56   :  { %471 = vmatprep.subr.mxu0 %v578_v0 }
  0x57   :  { %472 = vmatpush3.msra.mxu0 %v259_v39 }
  0x58   :  { %473 = vmatprep.subr.mxu0 %v578_v0 }
  0x59   :  { %474 = vmatpush3.msra.mxu0 %v258_v40 }
  0xf8   :  { %v159_v34 = vpop.f32.mrf.mxu0 }
  0xf9   :  { %v160_v35 = vadd.f32 %v360_v33, %v159_v34 }
  0xfa   :  { %v407_v36 = vpop.f32.mrf.mxu0 }
  0xfb   :  { %v163_v37 = vmax.f32 %v160_v35, 0.0 }
  0xfd   :  { %441 = vmatmul.mubr.f32.vlgmr.msra.gmra.mxu1 %v163_v37 }
 0x1bd   :  { %v253_v42 = vpop.f32.mrf.mxu1 }
 0x1be   :  { %v254_v43 = vadd.f32 %v362_v41, %v253_v42 }
 0x1bf   :  { %v442_v44 = vpop.f32.mrf.mxu1 }
 0x1c0   :  { %v257_v45 = vmax.f32 %v254_v43, 0.0 }
 0x1c2   :  { %476 = vmatmul.mubr.f32.vlgmr.msra.gmra.mxu0 %v257_v45 }
 0x282   :  { %v347_v47 = vpop.f32.mrf.mxu0 }
 0x283   :  { %v348_v48 = vadd.f32 %v363_v46, %v347_v47 }
 0x284   :  { %v477_v49 = vpop.f32.mrf.mxu0 }
 0x285   :  { %352 = vst.msk [vmem:[%s700_s7] sm:$0xff] %vm351_vm2, %v348_v48 }
 0x286   :  { %357 = vsyncpa [#allocation3], 1 }
 0x287   :  { %358 = vsyncpa [#allocation5], 1 }
 0x288   :  { %359 = vsyncpa [#allocation8], 1 }

</bundles_post_ra>
